<compile_context>
chip_gen: v7x
topology: tpu7x:2x2x1
jax: 0.10.0
libtpu: 0.0.40
codegen_flags: <defaults>
</compile_context>

<pallas_src>
import jax
import jax.numpy as jnp
from jax.experimental import pallas as pl
from jax.experimental.pallas import tpu as pltpu


def _round_up(x: int, m: int) -> int:
    return -(-x // m) * m


# ----------------------------------------------------------------------------
# Kernel: out = (v1 + v2) @ W_fold + b_fold   (the size-1-axis softmax == 1.0)
# ----------------------------------------------------------------------------
def _mha_eval_kernel(v1_ref, v2_ref, w_ref, b_ref, o_ref):
    vs = (v1_ref[...] + v2_ref[...]).astype(w_ref.dtype)          # [bm, H]
    acc = jnp.dot(vs, w_ref[...], preferred_element_type=jnp.float32)
    o_ref[...] = (acc + b_ref[...]).astype(o_ref.dtype)           # [bm, tile_n]


# ----------------------------------------------------------------------------
# One-time parameter folding (hoisted out of the per-call path on purpose).
# ----------------------------------------------------------------------------
def fold_attention_params(params, compute_dtype=jnp.float32):
    """Fold Wv/Wo/bv/bo into one lane-dense-padded weight [H, Hp] and bias [1, Hp].

    Call ONCE and reuse; doing this per forward call would add an HxHxH GEMM
    plus an HBM round-trip to every call.
    """
    hidden = params["wv"].shape[0]
    hp = _round_up(hidden, 128)                                    # lane-dense width
    w_fold = params["wv"].T @ params["wo"].T                       # [H, H]
    b_fold = (2.0 * params["bv"]) @ params["wo"].T + params["bo"]  # [H]
    if hp != hidden:
        w_fold = jnp.pad(w_fold, ((0, 0), (0, hp - hidden)))
        b_fold = jnp.pad(b_fold, (0, hp - hidden))
    return (w_fold.astype(compute_dtype),              # [H, Hp]
            b_fold.reshape(1, hp).astype(jnp.float32)) # [1, Hp]  (f32 bias add)


# ----------------------------------------------------------------------------
# Tiling heuristics
# ----------------------------------------------------------------------------
def _pick_block_rows(batch: int, hidden: int) -> int:
    # Cap so the two double-buffered input streams stay around <=16 MiB of VMEM.
    vmem_cap = max(8, min(512, ((1 << 20) // max(hidden, 1)) // 8 * 8))
    if batch <= 8:
        return batch                       # single block == full array dim (legal)
    if batch <= 2 * vmem_cap:
        # >=2 row blocks so both v7x TensorCores get work on the parallel axis.
        rows = _round_up(-(-batch // 2), 8)
        return min(rows, vmem_cap)
    return vmem_cap


def _pick_tile_n(hidden_padded: int) -> int:
    for t in (512, 384, 256, 128):
        if hidden_padded % t == 0:
            return t
    return hidden_padded                   # unreachable (hp is a multiple of 128)


# ----------------------------------------------------------------------------
# Forward from pre-folded params (the steady-state entry point)
# ----------------------------------------------------------------------------
def mha_eval_forward(v1, v2, w_fold, b_fold, hidden, compute_dtype=jnp.float32):
    """Eval-mode forward.  v1, v2: [B, 1, hidden] (or [B, hidden]).  Returns [B, hidden]."""
    batch = v1.shape[0]
    hp = w_fold.shape[1]
    v1_2d = v1.reshape(batch, hidden).astype(compute_dtype)
    v2_2d = v2.reshape(batch, hidden).astype(compute_dtype)
    w_fold = w_fold.astype(compute_dtype)

    block_rows = _pick_block_rows(batch, hidden)
    tile_n = _pick_tile_n(hp)
    n_row = pl.cdiv(batch, block_rows)
    n_col = hp // tile_n

    in_bytes = jnp.dtype(compute_dtype).itemsize
    vmem_bytes = (2 * 2 * block_rows * hidden * in_bytes   # v1, v2 (double-buffered)
                  + hidden * tile_n * in_bytes             # weight (single-buffered)
                  + tile_n * 4                             # bias
                  + 2 * block_rows * tile_n * 4)           # f32 output (double-buffered)
    vmem_limit = int(max(32 << 20, vmem_bytes + (4 << 20)))

    cost = pl.CostEstimate(
        flops=2 * batch * hidden * hp + batch * hidden,
        transcendentals=0,
        bytes_accessed=(2 * batch * hidden * in_bytes
                        + hidden * hp * in_bytes + hp * 4 + batch * hp * 4))

    def _call(single_buffer_invariants: bool):
        # The weight/bias block index only changes with the OUTER (column) grid
        # axis, so inside the row sweep it is loop-invariant and single
        # buffering it halves its VMEM footprint at no pipelining cost.
        inv = ({"pipeline_mode": pl.Buffered(1)}
               if single_buffer_invariants and hasattr(pl, "Buffered") else {})
        return pl.pallas_call(
            _mha_eval_kernel,
            out_shape=jax.ShapeDtypeStruct((batch, hp), jnp.float32),
            grid=(n_col, n_row),           # column axis outer, row axis inner
            in_specs=[
                pl.BlockSpec((block_rows, hidden), lambda j, i: (i, 0)),   # v1 rows
                pl.BlockSpec((block_rows, hidden), lambda j, i: (i, 0)),   # v2 rows
                pl.BlockSpec((hidden, tile_n), lambda j, i: (0, j), **inv),  # fused W
                pl.BlockSpec((1, tile_n), lambda j, i: (0, j), **inv),       # fused b
            ],
            out_specs=pl.BlockSpec((block_rows, tile_n), lambda j, i: (i, j)),
            compiler_params=pltpu.CompilerParams(
                dimension_semantics=("parallel", "parallel"),
                vmem_limit_bytes=vmem_limit),
            cost_estimate=cost,
        )(v1_2d, v2_2d, w_fold, b_fold)

    try:
        out = _call(True)
    except Exception:   # jax versions without BlockSpec.pipeline_mode support
        out = _call(False)

    return out if hp == hidden else out[:, :hidden]


# ----------------------------------------------------------------------------
# API-parity wrapper (folds per call; prefer fold_attention_params + forward)
# ----------------------------------------------------------------------------
def new_multi_head_attention(A, q, k, v1, v2, params, num_heads,
                             compute_dtype=jnp.float32):
    """Eval-mode forward.  A/q/k/num_heads do not affect the output because the
    softmax over the size-1 attention axis is identically 1.0 (dead path)."""
    del A, q, k, num_heads
    # TODO(synk): training-mode att_dropout (and the scores path it acts on) is
    # not implemented; this kernel is eval-mode / seq==1 only.
    hidden = params["wv"].shape[0]
    w_fold, b_fold = fold_attention_params(params, compute_dtype)
    return mha_eval_forward(v1, v2, w_fold, b_fold, hidden, compute_dtype)


# ----------------------------------------------------------------------------
# Pure-JAX line-by-line transcription of the PyTorch forward (reference check)
# ----------------------------------------------------------------------------
def _ref_forward(A, q, k, v1, v2, params, num_heads):
    B = q.shape[0]
    hidden = params["wq"].shape[0]
    d = hidden // num_heads
    scale = d ** (-0.5)

    def lin(x, w, b):
        return x @ w.T + b

    Q = lin(q, params["wq"], params["bq"]).reshape(B, -1, num_heads, d)
    K = lin(k, params["wk"], params["bk"]).reshape(B, -1, num_heads, d)
    V1 = lin(v1, params["wv"], params["bv"]).reshape(B, -1, num_heads, d)
    V2 = lin(v2, params["wv"], params["bv"]).reshape(B, -1, num_heads, d)
    Q = Q.transpose(0, 2, 1, 3)            # [B, H, 1, d]
    V1 = V1.transpose(0, 2, 1, 3)
    V2 = V2.transpose(0, 2, 1, 3)
    K = K.transpose(0, 2, 3, 1)            # [B, H, d, 1]
    x = jnp.matmul(Q * scale, K)           # [B, H, 1, 1]
    x = jnp.matmul(A, x.squeeze())[..., None, None]
    x = jax.nn.softmax(x, axis=3)          # size-1 axis -> exactly 1.0
    x1 = jnp.matmul(x, V1)
    x2 = jnp.matmul(x, V2)
    x = (x1 + x2).transpose(0, 2, 1, 3).reshape(B, -1, num_heads * d)
    return lin(x, params["wo"], params["bo"]).squeeze()


if __name__ == "__main__":
    B, hidden, num_heads, seq = 8, 32, 4, 1

    key = jax.random.PRNGKey(0)
    ks = jax.random.split(key, 13)
    params = {
        "wq": jax.random.normal(ks[0], (hidden, hidden), jnp.float32) * 0.1,
        "bq": jax.random.normal(ks[1], (hidden,), jnp.float32) * 0.1,
        "wk": jax.random.normal(ks[2], (hidden, hidden), jnp.float32) * 0.1,
        "bk": jax.random.normal(ks[3], (hidden,), jnp.float32) * 0.1,
        "wv": jax.random.normal(ks[4], (hidden, hidden), jnp.float32) * 0.1,
        "bv": jax.random.normal(ks[5], (hidden,), jnp.float32) * 0.1,
        "wo": jax.random.normal(ks[6], (hidden, hidden), jnp.float32) * 0.1,
        "bo": jax.random.normal(ks[7], (hidden,), jnp.float32) * 0.1,
    }

    A = jax.random.normal(ks[8], (B, B), jnp.float32)
    q = jax.random.normal(ks[9], (B, seq, hidden), jnp.float32)
    k = jax.random.normal(ks[10], (B, seq, hidden), jnp.float32)
    v1 = jax.random.normal(ks[11], (B, seq, hidden), jnp.float32)
    v2 = jax.random.normal(ks[12], (B, seq, hidden), jnp.float32)

    # Steady-state path: fold parameters once, reuse for every forward call.
    w_fold, b_fold = fold_attention_params(params)
    out = mha_eval_forward(v1, v2, w_fold, b_fold, hidden)
    out = jax.block_until_ready(out)

    ref = _ref_forward(A, q, k, v1, v2, params, num_heads)
    assert out.shape == (B, hidden), out.shape
    assert jnp.allclose(out, ref, atol=1e-4, rtol=1e-4), "mismatch vs reference"

    # API-parity wrapper (folds internally) -- same kernel, same result.
    out2 = jax.block_until_ready(
        new_multi_head_attention(A, q, k, v1, v2, params, num_heads))
    assert jnp.allclose(out2, ref, atol=1e-4, rtol=1e-4), "wrapper mismatch"

    print("KERNEL_OK")
</pallas_src>

<mosaic_0001>
module attributes {stable_mosaic.version = 11 : i64} {
  func.func @_mha_eval_kernel(%arg0: i32, %arg1: i32, %arg2: memref<8x32xf32, #tpu.memory_space<vmem>>, %arg3: memref<8x32xf32, #tpu.memory_space<vmem>>, %arg4: memref<32x128xf32, #tpu.memory_space<vmem>>, %arg5: memref<1x128xf32, #tpu.memory_space<vmem>>, %arg6: memref<8x128xf32, #tpu.memory_space<vmem>>) attributes {dimension_semantics = [#tpu.dimension_semantics<parallel>, #tpu.dimension_semantics<parallel>], iteration_bounds = array<i64: 1, 1>, scalar_prefetch = 0 : i64, scratch_operands = 0 : i64, tpu.core_type = #tpu.core_type<tc>, window_params = [{transform_indices = @transform_0, window_bounds = array<i64: 8, 32>}, {transform_indices = @transform_1, window_bounds = array<i64: 8, 32>}, {pipeline_mode = #tpu.pipeline_mode<synchronous>, transform_indices = @transform_2, window_bounds = array<i64: 32, 128>}, {pipeline_mode = #tpu.pipeline_mode<synchronous>, transform_indices = @transform_3, window_bounds = array<i64: 1, 128>}, {transform_indices = @transform_4, window_bounds = array<i64: 8, 128>}]} {
    %c0 = arith.constant 0 : index
    %c0_0 = arith.constant 0 : index
    %0 = vector.load %arg2[%c0, %c0_0] : memref<8x32xf32, #tpu.memory_space<vmem>>, vector<8x32xf32>
    %c0_1 = arith.constant 0 : index
    %c0_2 = arith.constant 0 : index
    %1 = vector.load %arg3[%c0_1, %c0_2] : memref<8x32xf32, #tpu.memory_space<vmem>>, vector<8x32xf32>
    %2 = arith.addf %0, %1 : vector<8x32xf32>
    %c0_3 = arith.constant 0 : index
    %c0_4 = arith.constant 0 : index
    %3 = vector.load %arg4[%c0_3, %c0_4] : memref<32x128xf32, #tpu.memory_space<vmem>>, vector<32x128xf32>
    %cst = arith.constant dense<0.000000e+00> : vector<8x128xf32>
    %4 = tpu.matmul %2, %3, %cst {dimension_numbers = #tpu.dot_dimension_numbers<[1], [0], [0], [1], [0, 0, 1, 1], [], []>} : vector<8x32xf32>, vector<32x128xf32>, vector<8x128xf32> -> vector<8x128xf32>
    %c0_5 = arith.constant 0 : index
    %c0_6 = arith.constant 0 : index
    %5 = vector.load %arg5[%c0_5, %c0_6] : memref<1x128xf32, #tpu.memory_space<vmem>>, vector<1x128xf32>
    %6 = vector.broadcast %5 : vector<1x128xf32> to vector<8x128xf32>
    %7 = arith.addf %4, %6 : vector<8x128xf32>
    %c0_7 = arith.constant 0 : index
    %c0_8 = arith.constant 0 : index
    %8 = vector.load %arg6[%c0_7, %c0_8] : memref<8x128xf32, #tpu.memory_space<vmem>>, vector<8x128xf32>
    tpu.vector_store %arg6[%c0_7, %c0_8], %7 {strides = array<i32>} : memref<8x128xf32, #tpu.memory_space<vmem>>, vector<8x128xf32>,
    return
  }
  func.func @transform_0(%arg0: i32, %arg1: i32) -> (i32, i32) {
    %c0_i32 = arith.constant 0 : i32
    %c0_i32_0 = arith.constant 0 : i32
    return %arg1, %c0_i32 : i32, i32
  }
  func.func @transform_1(%arg0: i32, %arg1: i32) -> (i32, i32) {
    %c0_i32 = arith.constant 0 : i32
    %c0_i32_0 = arith.constant 0 : i32
    return %arg1, %c0_i32 : i32, i32
  }
  func.func @transform_2(%arg0: i32, %arg1: i32) -> (i32, i32) {
    %c0_i32 = arith.constant 0 : i32
    %c0_i32_0 = arith.constant 0 : i32
    return %c0_i32, %arg0 : i32, i32
  }
  func.func @transform_3(%arg0: i32, %arg1: i32) -> (i32, i32) {
    %c0_i32 = arith.constant 0 : i32
    %c0_i32_0 = arith.constant 0 : i32
    return %c0_i32, %arg0 : i32, i32
  }
  func.func @transform_4(%arg0: i32, %arg1: i32) -> (i32, i32) {
    %c0_i32 = arith.constant 0 : i32
    return %arg1, %arg0 : i32, i32
  }
}

module attributes {stable_mosaic.version = 11 : i64} {
  func.func @_mha_eval_kernel(%arg0: i32, %arg1: i32, %arg2: memref<8x32xf32, #tpu.memory_space<vmem>>, %arg3: memref<8x32xf32, #tpu.memory_space<vmem>>, %arg4: memref<32x128xf32, #tpu.memory_space<vmem>>, %arg5: memref<1x128xf32, #tpu.memory_space<vmem>>, %arg6: memref<8x128xf32, #tpu.memory_space<vmem>>) attributes {dimension_semantics = [#tpu.dimension_semantics<parallel>, #tpu.dimension_semantics<parallel>], iteration_bounds = array<i64: 1, 1>, scalar_prefetch = 0 : i64, scratch_operands = 0 : i64, tpu.core_type = #tpu.core_type<tc>, window_params = [{transform_indices = @transform_0, window_bounds = array<i64: 8, 32>}, {transform_indices = @transform_1, window_bounds = array<i64: 8, 32>}, {transform_indices = @transform_2, window_bounds = array<i64: 32, 128>}, {transform_indices = @transform_3, window_bounds = array<i64: 1, 128>}, {transform_indices = @transform_4, window_bounds = array<i64: 8, 128>}]} {
    %c0 = arith.constant 0 : index
    %c0_0 = arith.constant 0 : index
    %0 = vector.load %arg2[%c0, %c0_0] : memref<8x32xf32, #tpu.memory_space<vmem>>, vector<8x32xf32>
    %c0_1 = arith.constant 0 : index
    %c0_2 = arith.constant 0 : index
    %1 = vector.load %arg3[%c0_1, %c0_2] : memref<8x32xf32, #tpu.memory_space<vmem>>, vector<8x32xf32>
    %2 = arith.addf %0, %1 : vector<8x32xf32>
    %c0_3 = arith.constant 0 : index
    %c0_4 = arith.constant 0 : index
    %3 = vector.load %arg4[%c0_3, %c0_4] : memref<32x128xf32, #tpu.memory_space<vmem>>, vector<32x128xf32>
    %cst = arith.constant dense<0.000000e+00> : vector<8x128xf32>
    %4 = tpu.matmul %2, %3, %cst {dimension_numbers = #tpu.dot_dimension_numbers<[1], [0], [0], [1], [0, 0, 1, 1], [], []>} : vector<8x32xf32>, vector<32x128xf32>, vector<8x128xf32> -> vector<8x128xf32>
    %c0_5 = arith.constant 0 : index
    %c0_6 = arith.constant 0 : index
    %5 = vector.load %arg5[%c0_5, %c0_6] : memref<1x128xf32, #tpu.memory_space<vmem>>, vector<1x128xf32>
    %6 = vector.broadcast %5 : vector<1x128xf32> to vector<8x128xf32>
    %7 = arith.addf %4, %6 : vector<8x128xf32>
    %c0_7 = arith.constant 0 : index
    %c0_8 = arith.constant 0 : index
    %8 = vector.load %arg6[%c0_7, %c0_8] : memref<8x128xf32, #tpu.memory_space<vmem>>, vector<8x128xf32>
    tpu.vector_store %arg6[%c0_7, %c0_8], %7 {strides = array<i32>} : memref<8x128xf32, #tpu.memory_space<vmem>>, vector<8x128xf32>,
    return
  }
  func.func @transform_0(%arg0: i32, %arg1: i32) -> (i32, i32) {
    %c0_i32 = arith.constant 0 : i32
    %c0_i32_0 = arith.constant 0 : i32
    return %arg1, %c0_i32 : i32, i32
  }
  func.func @transform_1(%arg0: i32, %arg1: i32) -> (i32, i32) {
    %c0_i32 = arith.constant 0 : i32
    %c0_i32_0 = arith.constant 0 : i32
    return %arg1, %c0_i32 : i32, i32
  }
  func.func @transform_2(%arg0: i32, %arg1: i32) -> (i32, i32) {
    %c0_i32 = arith.constant 0 : i32
    %c0_i32_0 = arith.constant 0 : i32
    return %c0_i32, %arg0 : i32, i32
  }
  func.func @transform_3(%arg0: i32, %arg1: i32) -> (i32, i32) {
    %c0_i32 = arith.constant 0 : i32
    %c0_i32_0 = arith.constant 0 : i32
    return %c0_i32, %arg0 : i32, i32
  }
  func.func @transform_4(%arg0: i32, %arg1: i32) -> (i32, i32) {
    %c0_i32 = arith.constant 0 : i32
    return %arg1, %arg0 : i32, i32
  }
}

</mosaic_0001>

<bundles_post_ra>
// kernel: tpu_custom_call.1
= control target key start
LH: loop header
LB: loop body
LE: loop exit
PB: predicated region body
PF: predicated region fallthrough
CT: control target
= control target key end

     0   :  { %9 = vsyncpa [#allocation3], 0  ;;  %s372_s0 = inlined_call_operand.hbm [shape: f32[8,32], index: 0, kind: input, shape index: {}]   ;;  %s373_s1 = inlined_call_operand.hbm [shape: f32[8,32], index: 1, kind: input, shape index: {}]   ;;  %s374_s2 = inlined_call_operand.hbm [shape: f32[32,128], index: 2, kind: input, shape index: {}]   ;;  %s375_s3 = inlined_call_operand.vmem [shape: f32[1,128], index: 3, kind: input, shape index: {}]   ;;  %s376_s4 = inlined_call_operand.hbm [shape: f32[8,128], index: 4, kind: output, shape index: {}]  }
   0x1   :  { %10 = vsyncpa [#allocation6], 0 }
   0x2   :  { %11 = vsyncpa [#allocation4], 0  ;;  %s287_s15 = smov [#allocation5]   ;;  %s288_s17 = smov [#allocation2]  }
   0x3   :  { %s28_s16 = sshll.u32 %s287_s15, 4  ;;  %s18_s18 = sshll.u32 %s288_s17, 4  ;;  %s29_s16 = int_to_ptr.vmem [resolvable:$true] %s28_s16  ;;  %s19_s18 = int_to_ptr.vmem [resolvable:$true] %s18_s18 }
   0x4   :  { %s193_s21 = scalar_lea.hbm %s373_s1, 128 }
   0x5   :  { %p194_p0 = scmp.ne.s32.totalorder %s373_s1, %s193_s21  ;;  %p197_p1 = scmp.lt.u32.totalorder %s193_s21, %s373_s1 }
   0x7   :  { %p199_p2 = pnand %p197_p1, %p194_p0 }
   0x9   :  { %202 = shalt.err (!%p199_p2)
}
   0xa   :  { %s203_s26 = scalar_lea.vmem %s29_s16, 128  ;;  %p208_p4 = scmp.lt.s32.totalorder %s29_s16, %s29_s16 }
   0xb   :  { %p204_p3 = scmp.ne.s32.totalorder %s29_s16, %s203_s26  ;;  %p209_p5 = scmp.lt.s32.totalorder %s203_s26, %s203_s26 }
   0xd   :  { %p210_p6 = por %p209_p5, %p208_p4 }
   0xf   :  { %p211_p7 = pnand %p210_p6, %p204_p3 }
  0x11   :  { %214 = shalt.err (!%p211_p7)
}
  0x12   :  { %31 = dma.hbm_to_vmem [thread:$0]  %s373_s1, 128, %s29_s16, [#allocation6]  }
  0x13   :  { %s215_s5 = scalar_lea.hbm %s372_s0, 128 }
  0x14   :  { %p216_p8 = scmp.ne.s32.totalorder %s372_s0, %s215_s5  ;;  %p219_p9 = scmp.lt.u32.totalorder %s215_s5, %s372_s0 }
  0x16   :  { %p221_p10 = pnand %p219_p9, %p216_p8 }
  0x18   :  { %224 = shalt.err (!%p221_p10)
}
  0x19   :  { %s225_s10 = scalar_lea.vmem %s19_s18, 128  ;;  %p230_p12 = scmp.lt.s32.totalorder %s19_s18, %s19_s18 }
  0x1a   :  { %p226_p11 = scmp.ne.s32.totalorder %s19_s18, %s225_s10  ;;  %p231_p13 = scmp.lt.s32.totalorder %s225_s10, %s225_s10 }
  0x1c   :  { %p232_p0 = por %p231_p13, %p230_p12 }
  0x1e   :  { %p233_p1 = pnand %p232_p0, %p226_p11 }
  0x20   :  { %236 = shalt.err (!%p233_p1)
}
  0x21   :  { %21 = dma.hbm_to_vmem [thread:$0]  %s372_s0, 128, %s19_s18, [#allocation3]  }
  0x22   :  { %s289_s12 = smov [#allocation7]   ;;  %s237_s16 = scalar_lea.hbm %s374_s2, 512 }
  0x23   :  { %s37_s13 = sshll.u32 %s289_s12, 4  ;;  %p238_p2 = scmp.ne.s32.totalorder %s374_s2, %s237_s16  ;;  %s38_s13 = int_to_ptr.vmem [resolvable:$true] %s37_s13 }
  0x24   :  { %p241_p3 = scmp.lt.u32.totalorder %s237_s16, %s374_s2 }
  0x26   :  { %p243_p4 = pnand %p241_p3, %p238_p2 }
  0x28   :  { %246 = shalt.err (!%p243_p4)
}
  0x29   :  { %s247_s22 = scalar_lea.vmem %s38_s13, 512  ;;  %p252_p6 = scmp.lt.s32.totalorder %s38_s13, %s38_s13 }
  0x2a   :  { %p248_p5 = scmp.ne.s32.totalorder %s38_s13, %s247_s22  ;;  %p253_p7 = scmp.lt.s32.totalorder %s247_s22, %s247_s22 }
  0x2c   :  { %p254_p8 = por %p253_p7, %p252_p6 }
  0x2e   :  { %p255_p9 = pnand %p254_p8, %p248_p5 }
  0x30   :  { %258 = shalt.err (!%p255_p9)
}
  0x31   :  { %s290_s0 = smov 128   ;;  %s291_s18 = smov 8  }
  0x32   :  { %43 = dma.hbm_to_vmem [thread:$0]  %s374_s2, 512, %s38_s13, [#allocation6], %s290_s0, %s290_s0, %s291_s18  }
  0x33   :  { %281 = dma.done.wait [#allocation3], 128  }
  0x34   :  { %282 = vsyncadd [#allocation3], 4294967168 }
  0x35   :  { %283 = dma.done.wait [#allocation6], 640  }
  0x36   :  { %284 = vsyncadd [#allocation6], 4294966656  ;;  %v292_v0 = vmov 0.0|0.0   ;;  %vm293_vm0 = vmmov 0   ;;  %v294_v1 = vmov 0.0   ;;  %v58_v2 = vld [vmem:[#allocation7] sm:$0xff] }
  0x37   :  { %178 = vmatprep.subr.bf16.mxu0 %v292_v0  ;;  %175 = vmatprep.mubr.msk.f32.mxu0 %vm293_vm0, %v294_v1  ;;  %v59_v3 = vld [vmem:[#allocation7 + $0x8] sm:$0xff]  ;;  %v60_v4 = vld [vmem:[#allocation7 + $0x10] sm:$0xff]  ;;  %v61_v6 = vld [vmem:[#allocation7 + $0x18] sm:$0xff]  ;;  %vm69_vm1 = vcmask 261120   ;;  %s295_s26 = smov [#allocation8]  }
  0x38   :  { %v179_v5 = vpack.c.bf16 %v59_v3, %v58_v2  ;;  %v182_v7 = vpack.c.bf16 %v61_v6, %v60_v4  ;;  %v55_v8 = vld [vmem:[#allocation2] sm:$0xff]  ;;  %v56_v9 = vld [vmem:[#allocation5] sm:$0xff]  ;;  %s150_s27 = sshll.u32 %s295_s26, 4  ;;  %s151_s27 = int_to_ptr.vmem [resolvable:$true] %s150_s27 }
  0x39   :  { %v57_v10 = vadd.f32 %v56_v9, %v55_v8  ;;  %v160_v11 = vld [vmem:[%s375_s3] ss:$0 sm:$0xff]  ;;  %s259_s28 = scalar_lea.vmem %s151_s27, 128  ;;  %p264_p11 = scmp.lt.s32.totalorder %s151_s27, %s151_s27 }
  0x3a   :  { %180 = vmatpush3.bf16.msra.mxu0 %v179_v5  ;;  %p260_p10 = scmp.ne.s32.totalorder %s151_s27, %s259_s28  ;;  %p265_p12 = scmp.lt.s32.totalorder %s259_s28, %s259_s28 }
  0x3b   :  { %181 = vmatprep.subr.bf16.mxu0 %v292_v0 }
  0x3c   :  { %p266_p13 = por %p265_p12, %p264_p11 }
  0x3e   :  { %183 = vmatpush3.bf16.msra.mxu0 %v182_v7  ;;  %p267_p0 = pnand %p266_p13, %p260_p10 }
  0x41   :  { %176 = vmatmul.mubr.msk.f32.vlgmr.msra.gmra.mrb[0].mxu0 %vm69_vm1, %v57_v10 }
 0x114   :  { %v139_v12 = vpop.f32.mrb[0].mxu0 }
 0x115   :  { %v140_v13 = vadd.f32 %v160_v11, %v139_v12  ;;  %v177_v14 = vpop.f32.mrb[1].mxu0 }
 0x117   :  { %143 = vst [vmem:[#allocation8] sm:$0xff] %v140_v13 }
 0x118   :  { %270 = shalt.err (!%p267_p0)
}
 0x119   :  { %s271_s5 = scalar_lea.hbm %s376_s4, 128 }
 0x11a   :  { %p272_p1 = scmp.ne.s32.totalorder %s376_s4, %s271_s5  ;;  %p275_p2 = scmp.lt.u32.totalorder %s271_s5, %s376_s4 }
 0x11c   :  { %p277_p3 = pnand %p275_p2, %p272_p1 }
 0x11e   :  { %280 = shalt.err (!%p277_p3)
}
 0x11f   :  { %153 = dma.vmem_to_hbm [thread:$0]  %s151_s27, 128, %s376_s4, [#allocation4]  }
 0x120   :  { %285 = dma.done.wait [#allocation4], 128  }
 0x121   :  { %286 = vsyncadd [#allocation4], 4294967168 }
 0x122   :  { %157 = vsyncpa [#allocation3], 1 }
 0x123   :  { %158 = vsyncpa [#allocation6], 1 }
 0x124   :  { %159 = vsyncpa [#allocation4], 1 }

// kernel: tpu_custom_call.1
= control target key start
LH: loop header
LB: loop body
LE: loop exit
PB: predicated region body
PF: predicated region fallthrough
CT: control target
= control target key end

     0   :  { %9 = vsyncpa [#allocation3], 0  ;;  %s372_s0 = inlined_call_operand.hbm [shape: f32[8,32], index: 0, kind: input, shape index: {}]   ;;  %s373_s1 = inlined_call_operand.hbm [shape: f32[8,32], index: 1, kind: input, shape index: {}]   ;;  %s374_s2 = inlined_call_operand.hbm [shape: f32[32,128], index: 2, kind: input, shape index: {}]   ;;  %s375_s3 = inlined_call_operand.vmem [shape: f32[1,128], index: 3, kind: input, shape index: {}]   ;;  %s376_s4 = inlined_call_operand.hbm [shape: f32[8,128], index: 4, kind: output, shape index: {}]  }
   0x1   :  { %10 = vsyncpa [#allocation6], 0 }
   0x2   :  { %11 = vsyncpa [#allocation4], 0  ;;  %s287_s15 = smov [#allocation5]   ;;  %s288_s17 = smov [#allocation2]  }
   0x3   :  { %s28_s16 = sshll.u32 %s287_s15, 4  ;;  %s18_s18 = sshll.u32 %s288_s17, 4  ;;  %s29_s16 = int_to_ptr.vmem [resolvable:$true] %s28_s16  ;;  %s19_s18 = int_to_ptr.vmem [resolvable:$true] %s18_s18 }
   0x4   :  { %s193_s21 = scalar_lea.hbm %s373_s1, 128 }
   0x5   :  { %p194_p0 = scmp.ne.s32.totalorder %s373_s1, %s193_s21  ;;  %p197_p1 = scmp.lt.u32.totalorder %s193_s21, %s373_s1 }
   0x7   :  { %p199_p2 = pnand %p197_p1, %p194_p0 }
   0x9   :  { %202 = shalt.err (!%p199_p2)
}
   0xa   :  { %s203_s26 = scalar_lea.vmem %s29_s16, 128  ;;  %p208_p4 = scmp.lt.s32.totalorder %s29_s16, %s29_s16 }
   0xb   :  { %p204_p3 = scmp.ne.s32.totalorder %s29_s16, %s203_s26  ;;  %p209_p5 = scmp.lt.s32.totalorder %s203_s26, %s203_s26 }
   0xd   :  { %p210_p6 = por %p209_p5, %p208_p4 }
   0xf   :  { %p211_p7 = pnand %p210_p6, %p204_p3 }
  0x11   :  { %214 = shalt.err (!%p211_p7)
}
  0x12   :  { %31 = dma.hbm_to_vmem [thread:$0]  %s373_s1, 128, %s29_s16, [#allocation6]  }
  0x13   :  { %s215_s5 = scalar_lea.hbm %s372_s0, 128 }
  0x14   :  { %p216_p8 = scmp.ne.s32.totalorder %s372_s0, %s215_s5  ;;  %p219_p9 = scmp.lt.u32.totalorder %s215_s5, %s372_s0 }
  0x16   :  { %p221_p10 = pnand %p219_p9, %p216_p8 }
  0x18   :  { %224 = shalt.err (!%p221_p10)
}
  0x19   :  { %s225_s10 = scalar_lea.vmem %s19_s18, 128  ;;  %p230_p12 = scmp.lt.s32.totalorder %s19_s18, %s19_s18 }
  0x1a   :  { %p226_p11 = scmp.ne.s32.totalorder %s19_s18, %s225_s10  ;;  %p231_p13 = scmp.lt.s32.totalorder %s225_s10, %s225_s10 }
  0x1c   :  { %p232_p0 = por %p231_p13, %p230_p12 }
  0x1e   :  { %p233_p1 = pnand %p232_p0, %p226_p11 }
  0x20   :  { %236 = shalt.err (!%p233_p1)
}
  0x21   :  { %21 = dma.hbm_to_vmem [thread:$0]  %s372_s0, 128, %s19_s18, [#allocation3]  }
  0x22   :  { %s289_s12 = smov [#allocation7]   ;;  %s237_s16 = scalar_lea.hbm %s374_s2, 512 }
  0x23   :  { %s37_s13 = sshll.u32 %s289_s12, 4  ;;  %p238_p2 = scmp.ne.s32.totalorder %s374_s2, %s237_s16  ;;  %s38_s13 = int_to_ptr.vmem [resolvable:$true] %s37_s13 }
  0x24   :  { %p241_p3 = scmp.lt.u32.totalorder %s237_s16, %s374_s2 }
  0x26   :  { %p243_p4 = pnand %p241_p3, %p238_p2 }
  0x28   :  { %246 = shalt.err (!%p243_p4)
}
  0x29   :  { %s247_s22 = scalar_lea.vmem %s38_s13, 512  ;;  %p252_p6 = scmp.lt.s32.totalorder %s38_s13, %s38_s13 }
  0x2a   :  { %p248_p5 = scmp.ne.s32.totalorder %s38_s13, %s247_s22  ;;  %p253_p7 = scmp.lt.s32.totalorder %s247_s22, %s247_s22 }
  0x2c   :  { %p254_p8 = por %p253_p7, %p252_p6 }
  0x2e   :  { %p255_p9 = pnand %p254_p8, %p248_p5 }
  0x30   :  { %258 = shalt.err (!%p255_p9)
}
  0x31   :  { %s290_s0 = smov 128   ;;  %s291_s18 = smov 8  }
  0x32   :  { %43 = dma.hbm_to_vmem [thread:$0]  %s374_s2, 512, %s38_s13, [#allocation6], %s290_s0, %s290_s0, %s291_s18  }
  0x33   :  { %281 = dma.done.wait [#allocation3], 128  }
  0x34   :  { %282 = vsyncadd [#allocation3], 4294967168 }
  0x35   :  { %283 = dma.done.wait [#allocation6], 640  }
  0x36   :  { %284 = vsyncadd [#allocation6], 4294966656  ;;  %v292_v0 = vmov 0.0|0.0   ;;  %vm293_vm0 = vmmov 0   ;;  %v294_v1 = vmov 0.0   ;;  %v58_v2 = vld [vmem:[#allocation7] sm:$0xff] }
  0x37   :  { %178 = vmatprep.subr.bf16.mxu0 %v292_v0  ;;  %175 = vmatprep.mubr.msk.f32.mxu0 %vm293_vm0, %v294_v1  ;;  %v59_v3 = vld [vmem:[#allocation7 + $0x8] sm:$0xff]  ;;  %v60_v4 = vld [vmem:[#allocation7 + $0x10] sm:$0xff]  ;;  %v61_v6 = vld [vmem:[#allocation7 + $0x18] sm:$0xff]  ;;  %vm69_vm1 = vcmask 261120   ;;  %s295_s26 = smov [#allocation8]  }
  0x38   :  { %v179_v5 = vpack.c.bf16 %v59_v3, %v58_v2  ;;  %v182_v7 = vpack.c.bf16 %v61_v6, %v60_v4  ;;  %v55_v8 = vld [vmem:[#allocation2] sm:$0xff]  ;;  %v56_v9 = vld [vmem:[#allocation5] sm:$0xff]  ;;  %s150_s27 = sshll.u32 %s295_s26, 4  ;;  %s151_s27 = int_to_ptr.vmem [resolvable:$true] %s150_s27 }
  0x39   :  { %v57_v10 = vadd.f32 %v56_v9, %v55_v8  ;;  %v160_v11 = vld [vmem:[%s375_s3] ss:$0 sm:$0xff]  ;;  %s259_s28 = scalar_lea.vmem %s151_s27, 128  ;;  %p264_p11 = scmp.lt.s32.totalorder %s151_s27, %s151_s27 }
  0x3a   :  { %180 = vmatpush3.bf16.msra.mxu0 %v179_v5  ;;  %p260_p10 = scmp.ne.s32.totalorder %s151_s27, %s259_s28  ;;  %p265_p12 = scmp.lt.s32.totalorder %s259_s28, %s259_s28 }
  0x3b   :  { %181 = vmatprep.subr.bf16.mxu0 %v292_v0 }
  0x3c   :  { %p266_p13 = por %p265_p12, %p264_p11 }
  0x3e   :  { %183 = vmatpush3.bf16.msra.mxu0 %v182_v7  ;;  %p267_p0 = pnand %p266_p13, %p260_p10 }
  0x41   :  { %176 = vmatmul.mubr.msk.f32.vlgmr.msra.gmra.mrb[0].mxu0 %vm69_vm1, %v57_v10 }
 0x114   :  { %v139_v12 = vpop.f32.mrb[0].mxu0 }
 0x115   :  { %v140_v13 = vadd.f32 %v160_v11, %v139_v12  ;;  %v177_v14 = vpop.f32.mrb[1].mxu0 }
 0x117   :  { %143 = vst [vmem:[#allocation8] sm:$0xff] %v140_v13 }
 0x118   :  { %270 = shalt.err (!%p267_p0)
}
 0x119   :  { %s271_s5 = scalar_lea.hbm %s376_s4, 128 }
 0x11a   :  { %p272_p1 = scmp.ne.s32.totalorder %s376_s4, %s271_s5  ;;  %p275_p2 = scmp.lt.u32.totalorder %s271_s5, %s376_s4 }
 0x11c   :  { %p277_p3 = pnand %p275_p2, %p272_p1 }
 0x11e   :  { %280 = shalt.err (!%p277_p3)
}
 0x11f   :  { %153 = dma.vmem_to_hbm [thread:$0]  %s151_s27, 128, %s376_s4, [#allocation4]  }
 0x120   :  { %285 = dma.done.wait [#allocation4], 128  }
 0x121   :  { %286 = vsyncadd [#allocation4], 4294967168 }
 0x122   :  { %157 = vsyncpa [#allocation3], 1 }
 0x123   :  { %158 = vsyncpa [#allocation6], 1 }
 0x124   :  { %159 = vsyncpa [#allocation4], 1 }

</bundles_post_ra>
